<compile_context>
chip_gen: v7x
topology: tpu7x:2x2x1
jax: 0.10.0
libtpu: 0.0.40
codegen_flags: <defaults>
</compile_context>

<pallas_src>
import math

import jax
import jax.numpy as jnp
from jax import lax
from jax.experimental import pallas as pl
from jax.experimental.pallas import tpu as pltpu


def _round_up(x, m):
    return ((x + m - 1) // m) * m


def _pick_tile(n, preferred, multiple):
    """Largest tile <= preferred (a multiple of `multiple`) that still yields
    >= 2 grid steps when possible (megacore sharding on v7x)."""
    t = max(multiple, _round_up(min(preferred, _round_up(n, multiple)), multiple))
    while t > multiple and _round_up(n, t) // t < 2:
        t = max(multiple, _round_up(t // 2, multiple))
    return t


def _vmem_limit_bytes():
    cap = 128 * 1024 * 1024
    try:
        info = pltpu.get_tpu_info()
        cap = int(getattr(info, "vmem_capacity_bytes", cap) or cap)
    except Exception:
        pass
    # ~54 MiB on v7x (64 MiB physical), ~108 MiB on v5e/v6e (128 MiB physical).
    return min(int(cap * 0.85), 112 * 1024 * 1024)


# ----------------------------------------------------------------------------
# Kernel A: per-edge projections + per-head attention logits (grid over edges)
# ----------------------------------------------------------------------------
def _edge_kernel(feat_att_ref,   # (TE, FA)       bf16
                 feat_aggr_ref,  # (TE, FG)       bf16
                 w_att_ref,      # (FA, dout_pad) bf16  (resident)
                 b_att_ref,      # (1, dout_pad)  f32
                 w_aggr_ref,     # (FG, dout_pad) bf16  (resident)
                 b_aggr_ref,     # (1, dout_pad)  f32
                 head_mat_ref,   # (H, dout_pad)  f32   head_sel * attn_vec
                 raw_t_ref,      # out: (H, TE)   f32   per-head logits, lane-dense
                 aggr_ref):      # out: (TE, dout_pad) bf16
    # attention projection + LeakyReLU(0.2)
    att = jnp.dot(feat_att_ref[...], w_att_ref[...],
                  preferred_element_type=jnp.float32) + b_att_ref[...]
    att = jnp.where(att >= 0.0, att, 0.2 * att)                    # (TE, dout_pad)

    # per-head logits directly in (H, TE) layout (edges on the lane dim)
    raw_t_ref[...] = lax.dot_general(
        head_mat_ref[...], att,
        dimension_numbers=(((1,), (1,)), ((), ())),
        preferred_element_type=jnp.float32)                        # (H, TE)

    # aggregation projection, stored bf16
    aggr = jnp.dot(feat_aggr_ref[...], w_aggr_ref[...],
                   preferred_element_type=jnp.float32) + b_aggr_ref[...]
    aggr_ref[...] = aggr.astype(aggr_ref.dtype)


# ----------------------------------------------------------------------------
# Kernel B: segment-softmax aggregation (grid over entity tiles) — two matmuls
# ----------------------------------------------------------------------------
def _entity_kernel(tail_ref,     # (1, E)         int32 (resident)
                   weighted_ref, # (E, dout_pad)  bf16  (resident)
                   attn_t_ref,   # (H, E)         bf16  (resident)
                   head_sel_ref, # (H, dout_pad)  f32   (resident)
                   out_ref):     # (TN, dout_pad) f32
    tn, dpad = out_ref.shape
    e = tail_ref.shape[1]

    # onehot tile built on the fly: oh[n, e] = 1 iff tail[e] == (base + n).
    # Padded edges carry tail = -1 and padded entity rows never match -> 0.
    base = pl.program_id(0) * tn
    rows = base + lax.broadcasted_iota(jnp.int32, (tn, e), 0)
    oh = jnp.where(rows == tail_ref[...], 1.0, 0.0).astype(jnp.bfloat16)

    # numer[n, :] = sum_e oh[n, e] * attn_expanded[e, :] * aggr[e, :]
    numer = jnp.dot(oh, weighted_ref[...],
                    preferred_element_type=jnp.float32)            # (TN, dout_pad)

    # per-tail sum of exp (softmax denominator): (TN, H) then expand over dout
    seg_sum = lax.dot_general(oh, attn_t_ref[...],
                              dimension_numbers=(((1,), (1,)), ((), ())),
                              preferred_element_type=jnp.float32)  # (TN, H)
    denom = jnp.dot(seg_sum, head_sel_ref[...],
                    preferred_element_type=jnp.float32)            # (TN, dout_pad)

    out_ref[...] = numer * pl.reciprocal(denom + 1e-16, approx=True)


# ----------------------------------------------------------------------------
# Wrapper: glue (gathers, segment max, padding) + the two pallas_calls
# ----------------------------------------------------------------------------
def ingram_entity_forward(params, emb_ent, emb_rel, triplets, num_head,
                          ent_tile=256, edge_tile=512):
    f32, bf16 = jnp.float32, jnp.bfloat16
    num_ent = emb_ent.shape[0]
    dout = params["w_att"].shape[1]
    dim_hid = dout // num_head

    head_idx = triplets[:, 0]
    rel_idx = triplets[:, 1]
    tail_idx = triplets[:, 2]

    # ---- self-relation feature: mean of incoming relation embeddings (f32) --
    ones = jnp.ones_like(tail_idx, dtype=f32)
    ent_freq = jax.ops.segment_sum(ones, tail_idx, num_segments=num_ent)[:, None]
    ent_freq = jnp.maximum(ent_freq, 1.0)     # guard 0/0 (PyTorch would NaN)
    rel_g = emb_rel[rel_idx]
    self_rel = jax.ops.segment_sum(rel_g, tail_idx, num_segments=num_ent) / ent_freq

    # cast to bf16 BEFORE the large gathers/concats (halves wrapper HBM traffic)
    emb_rels = jnp.concatenate([rel_g, self_rel], axis=0).astype(bf16)
    emb_ent_b = emb_ent.astype(bf16)
    loops = jnp.arange(num_ent, dtype=tail_idx.dtype)
    head_full = jnp.concatenate([head_idx, loops])
    tail_full = jnp.concatenate([tail_idx, loops]).astype(jnp.int32)

    feat_att = jnp.concatenate(
        [emb_ent_b[tail_full], emb_ent_b[head_full], emb_rels], axis=-1)
    feat_aggr = jnp.concatenate([emb_ent_b[head_full], emb_rels], axis=-1)

    num_edges = feat_att.shape[0]
    fa, fg = feat_att.shape[1], feat_aggr.shape[1]
    fa_pad, fg_pad = _round_up(fa, 128), _round_up(fg, 128)
    dout_pad = _round_up(dout, 128)

    TE = _pick_tile(num_edges, edge_tile, 128)
    TN = _pick_tile(num_ent, ent_tile, 8)
    e_pad = _round_up(num_edges, TE)
    ne_pad = _round_up(num_ent, TN)
    pad_e = e_pad - num_edges

    feat_att = jnp.pad(feat_att, ((0, pad_e), (0, fa_pad - fa)))
    feat_aggr = jnp.pad(feat_aggr, ((0, pad_e), (0, fg_pad - fg)))
    # padded edges get tail = -1 -> never match any entity row in kernel B
    tail_pad = jnp.concatenate(
        [tail_full, jnp.full((pad_e,), -1, jnp.int32)]).reshape(1, e_pad)

    # ---- padded parameters (zero-padded cols/rows contribute exactly 0) -----
    w_att = jnp.zeros((fa_pad, dout_pad), f32).at[:fa, :dout].set(
        params["w_att"]).astype(bf16)
    w_aggr = jnp.zeros((fg_pad, dout_pad), f32).at[:fg, :dout].set(
        params["w_aggr"]).astype(bf16)
    b_att = jnp.zeros((1, dout_pad), f32).at[:, :dout].set(
        params["b_att"].reshape(1, dout))
    b_aggr = jnp.zeros((1, dout_pad), f32).at[:, :dout].set(
        params["b_aggr"].reshape(1, dout))
    head_sel = jnp.zeros((num_head, dout_pad), f32).at[:, :dout].set(
        jnp.kron(jnp.eye(num_head, dtype=f32), jnp.ones((1, dim_hid), f32)))
    attn_flat = jnp.zeros((1, dout_pad), f32).at[:, :dout].set(
        params["attn_vec"].reshape(1, dout).astype(f32))
    head_mat = head_sel * attn_flat                                 # (H, dout_pad)

    vmem_limit = _vmem_limit_bytes()

    # ------------------------- kernel A: per-edge ----------------------------
    n_edge_tiles = e_pad // TE
    cost_a = pl.CostEstimate(
        flops=2 * e_pad * dout_pad * (fa_pad + fg_pad + num_head),
        transcendentals=0,
        bytes_accessed=(e_pad * (fa_pad + fg_pad) * 2
                        + (fa_pad + fg_pad) * dout_pad * 2
                        + num_head * e_pad * 4 + e_pad * dout_pad * 2))
    raw_t, aggr = pl.pallas_call(
        _edge_kernel,
        out_shape=(jax.ShapeDtypeStruct((num_head, e_pad), f32),
                   jax.ShapeDtypeStruct((e_pad, dout_pad), bf16)),
        grid=(n_edge_tiles,),
        in_specs=[
            pl.BlockSpec((TE, fa_pad), lambda j: (j, 0)),
            pl.BlockSpec((TE, fg_pad), lambda j: (j, 0)),
            pl.BlockSpec((fa_pad, dout_pad), lambda j: (0, 0)),   # resident
            pl.BlockSpec((1, dout_pad), lambda j: (0, 0)),
            pl.BlockSpec((fg_pad, dout_pad), lambda j: (0, 0)),   # resident
            pl.BlockSpec((1, dout_pad), lambda j: (0, 0)),
            pl.BlockSpec((num_head, dout_pad), lambda j: (0, 0)),
        ],
        out_specs=(
            pl.BlockSpec((num_head, TE), lambda j: (0, j)),
            pl.BlockSpec((TE, dout_pad), lambda j: (j, 0)),
        ),
        compiler_params=pltpu.CompilerParams(
            dimension_semantics=("parallel",),
            vmem_limit_bytes=vmem_limit),
        cost_estimate=cost_a,
    )(feat_att, feat_aggr, w_att, b_att, w_aggr, b_aggr, head_mat)

    # ---- per-edge softmax pieces, computed ONCE (tiny: E x H / E x dout) -----
    raw = raw_t.T[:num_edges]                                       # (E, H) f32
    seg_max = jax.ops.segment_max(raw, tail_full, num_segments=num_ent)
    attn = jnp.exp(raw - seg_max[tail_full])                        # (E, H), <= 1
    attn = jnp.pad(attn, ((0, pad_e), (0, 0))).astype(bf16)         # pads -> 0
    attn_t = attn.T                                                 # (H, e_pad)
    # expand per-head exp weights across dim_hid and fold into the aggregation;
    # same bf16-rounded attn feeds both numerator and denominator.
    weighted = (jnp.dot(attn.astype(f32), head_sel)
                * aggr.astype(f32)).astype(bf16)                    # (e_pad, dout_pad)

    # ----------------------- kernel B: per-entity tile -----------------------
    n_ent_tiles = ne_pad // TN
    cost_b = pl.CostEstimate(
        flops=(2 * ne_pad * e_pad * (dout_pad + num_head)
               + 2 * ne_pad * num_head * dout_pad),
        transcendentals=0,
        bytes_accessed=(e_pad * dout_pad * 2 + num_head * e_pad * 2
                        + e_pad * 4 + ne_pad * dout_pad * 4))
    out = pl.pallas_call(
        _entity_kernel,
        out_shape=jax.ShapeDtypeStruct((ne_pad, dout_pad), f32),
        grid=(n_ent_tiles,),
        in_specs=[
            pl.BlockSpec((1, e_pad), lambda i: (0, 0)),             # resident
            pl.BlockSpec((e_pad, dout_pad), lambda i: (0, 0)),      # resident
            pl.BlockSpec((num_head, e_pad), lambda i: (0, 0)),      # resident
            pl.BlockSpec((num_head, dout_pad), lambda i: (0, 0)),   # resident
        ],
        out_specs=pl.BlockSpec((TN, dout_pad), lambda i: (i, 0)),
        compiler_params=pltpu.CompilerParams(
            dimension_semantics=("parallel",),
            vmem_limit_bytes=vmem_limit),
        cost_estimate=cost_b,
    )(tail_pad, weighted, attn_t, head_sel)

    return out[:num_ent, :dout]


# ----------------------------------------------------------------------------
# Pure-JAX reference (mirrors the PyTorch forward) for a sanity check
# ----------------------------------------------------------------------------
def reference_forward(params, emb_ent, emb_rel, triplets, num_head):
    num_ent = emb_ent.shape[0]
    dout = params["w_att"].shape[1]
    dim_hid = dout // num_head

    h = triplets[:, 0]
    r = triplets[:, 1]
    t = triplets[:, 2]
    ent_freq = jax.ops.segment_sum(jnp.ones_like(t, jnp.float32), t, num_ent)[:, None]
    ent_freq = jnp.maximum(ent_freq, 1.0)   # same guard as the kernel wrapper
    rel_g = emb_rel[r]
    self_rel = jax.ops.segment_sum(rel_g, t, num_ent) / ent_freq
    emb_rels = jnp.concatenate([rel_g, self_rel], 0)
    hf = jnp.concatenate([h, jnp.arange(num_ent, dtype=h.dtype)])
    tf = jnp.concatenate([t, jnp.arange(num_ent, dtype=t.dtype)])

    cat_att = jnp.concatenate([emb_ent[tf], emb_ent[hf], emb_rels], -1)
    att = cat_att @ params["w_att"] + params["b_att"]
    att = jnp.where(att >= 0.0, att, 0.2 * att).reshape(-1, num_head, dim_hid)
    raw = (att * params["attn_vec"][None]).sum(-1, keepdims=True)   # (E, H, 1)

    seg_max = jax.ops.segment_max(raw, tf, num_ent)
    attn_val = jnp.exp(raw - seg_max[tf])
    sums = jax.ops.segment_sum(attn_val, tf, num_ent)
    beta = attn_val / (sums[tf] + 1e-16)

    cat = jnp.concatenate([emb_ent[hf], emb_rels], -1)
    aggr = (cat @ params["w_aggr"] + params["b_aggr"]).reshape(-1, num_head, dim_hid)
    out = jax.ops.segment_sum(beta * aggr, tf, num_ent)
    return out.reshape(num_ent, -1)


# ----------------------------------------------------------------------------
# Deterministic parameter init (xavier_normal with gain('relu') = sqrt(2))
# ----------------------------------------------------------------------------
def init_params(key, dim_in_ent, dim_out_ent, dim_rel, num_head):
    dim_hid = dim_out_ent // num_head
    gain = math.sqrt(2.0)
    k1, k2, k3 = jax.random.split(key, 3)

    def xavier(k, fan_in, fan_out, shape):
        std = gain * math.sqrt(2.0 / (fan_in + fan_out))
        return std * jax.random.normal(k, shape, jnp.float32)

    fa = 2 * dim_in_ent + dim_rel
    fg = dim_in_ent + dim_rel
    # weights stored as (in, out) = transpose of PyTorch Linear weight
    w_att = xavier(k1, fa, dim_out_ent, (fa, dim_out_ent))
    w_aggr = xavier(k2, fg, dim_out_ent, (fg, dim_out_ent))
    # attn_vec parameter has torch shape (1, num_head, dim_hid) -> keep (H, Dh)
    attn_vec = xavier(k3, num_head * dim_hid, dim_hid, (num_head, dim_hid))
    return {
        "w_att": w_att,
        "b_att": jnp.zeros((1, dim_out_ent), jnp.float32),
        "w_aggr": w_aggr,
        "b_aggr": jnp.zeros((1, dim_out_ent), jnp.float32),
        "attn_vec": attn_vec,
    }


if __name__ == "__main__":
    # small, deterministic problem
    num_ent, num_rel, num_tri = 16, 6, 24
    dim_in_ent, dim_out_ent, dim_rel, num_head = 32, 32, 16, 8

    key = jax.random.PRNGKey(0)
    kp, ke, kr, kh, krel, kt = jax.random.split(key, 6)

    params = init_params(kp, dim_in_ent, dim_out_ent, dim_rel, num_head)
    emb_ent = jax.random.normal(ke, (num_ent, dim_in_ent), jnp.float32)
    emb_rel = jax.random.normal(kr, (num_rel, dim_rel), jnp.float32)

    # tails cover every entity at least once (well-formed graph); rest random
    tails = jnp.concatenate(
        [jnp.arange(num_ent, dtype=jnp.int32),
         jax.random.randint(kt, (num_tri - num_ent,), 0, num_ent, jnp.int32)])
    heads = jax.random.randint(kh, (num_tri,), 0, num_ent, jnp.int32)
    rels = jax.random.randint(krel, (num_tri,), 0, num_rel, jnp.int32)
    triplets = jnp.stack([heads, rels, tails], axis=1)    # (num_tri, 3)

    out = ingram_entity_forward(params, emb_ent, emb_rel, triplets, num_head)
    out = jax.block_until_ready(out)

    ref = jax.block_until_ready(
        reference_forward(params, emb_ent, emb_rel, triplets, num_head))

    assert out.shape == (num_ent, dim_out_ent), out.shape
    max_err = float(jnp.max(jnp.abs(out - ref)))
    assert jnp.allclose(out, ref, rtol=5e-2, atol=5e-2), max_err

    print("KERNEL_OK")
</pallas_src>

<mosaic_0001>
module attributes {stable_mosaic.version = 11 : i64} {
  func.func @_edge_kernel(%arg0: i32, %arg1: memref<128x128xbf16, #tpu.memory_space<vmem>>, %arg2: memref<128x128xbf16, #tpu.memory_space<vmem>>, %arg3: memref<128x128xbf16, #tpu.memory_space<vmem>>, %arg4: memref<1x128xf32, #tpu.memory_space<vmem>>, %arg5: memref<128x128xbf16, #tpu.memory_space<vmem>>, %arg6: memref<1x128xf32, #tpu.memory_space<vmem>>, %arg7: memref<8x128xf32, #tpu.memory_space<vmem>>, %arg8: memref<8x128xf32, #tpu.memory_space<vmem>>, %arg9: memref<128x128xbf16, #tpu.memory_space<vmem>>) attributes {dimension_semantics = [#tpu.dimension_semantics<parallel>], iteration_bounds = array<i64: 1>, scalar_prefetch = 0 : i64, scratch_operands = 0 : i64, tpu.core_type = #tpu.core_type<tc>, window_params = [{transform_indices = @transform_0, window_bounds = array<i64: 128, 128>}, {transform_indices = @transform_1, window_bounds = array<i64: 128, 128>}, {pipeline_mode = #tpu.pipeline_mode<synchronous>, transform_indices = @transform_2, window_bounds = array<i64: 128, 128>}, {pipeline_mode = #tpu.pipeline_mode<synchronous>, transform_indices = @transform_3, window_bounds = array<i64: 1, 128>}, {pipeline_mode = #tpu.pipeline_mode<synchronous>, transform_indices = @transform_4, window_bounds = array<i64: 128, 128>}, {pipeline_mode = #tpu.pipeline_mode<synchronous>, transform_indices = @transform_5, window_bounds = array<i64: 1, 128>}, {pipeline_mode = #tpu.pipeline_mode<synchronous>, transform_indices = @transform_6, window_bounds = array<i64: 8, 128>}, {transform_indices = @transform_7, window_bounds = array<i64: 8, 128>}, {transform_indices = @transform_8, window_bounds = array<i64: 128, 128>}]} {
    %c0 = arith.constant 0 : index
    %c0_0 = arith.constant 0 : index
    %0 = vector.load %arg1[%c0, %c0_0] : memref<128x128xbf16, #tpu.memory_space<vmem>>, vector<128x128xbf16>
    %c0_1 = arith.constant 0 : index
    %c0_2 = arith.constant 0 : index
    %1 = vector.load %arg3[%c0_1, %c0_2] : memref<128x128xbf16, #tpu.memory_space<vmem>>, vector<128x128xbf16>
    %cst = arith.constant dense<0.000000e+00> : vector<128x128xf32>
    %2 = tpu.matmul %0, %1, %cst {dimension_numbers = #tpu.dot_dimension_numbers<[1], [0], [0], [1], [0, 0, 1, 1], [], []>} : vector<128x128xbf16>, vector<128x128xbf16>, vector<128x128xf32> -> vector<128x128xf32>
    %c0_3 = arith.constant 0 : index
    %c0_4 = arith.constant 0 : index
    %3 = vector.load %arg4[%c0_3, %c0_4] : memref<1x128xf32, #tpu.memory_space<vmem>>, vector<1x128xf32>
    %4 = vector.broadcast %3 : vector<1x128xf32> to vector<128x128xf32>
    %5 = arith.addf %2, %4 : vector<128x128xf32>
    %cst_5 = arith.constant 0.000000e+00 : f32
    %6 = vector.broadcast %cst_5 : f32 to vector<128x128xf32>
    %7 = arith.cmpf oge, %5, %6 : vector<128x128xf32>
    %cst_6 = arith.constant 2.000000e-01 : f32
    %8 = vector.broadcast %cst_6 : f32 to vector<128x128xf32>
    %9 = arith.mulf %8, %5 : vector<128x128xf32>
    %10 = arith.select %7, %5, %9 : vector<128x128xi1>, vector<128x128xf32>
    %c0_7 = arith.constant 0 : index
    %c0_8 = arith.constant 0 : index
    %11 = vector.load %arg7[%c0_7, %c0_8] : memref<8x128xf32, #tpu.memory_space<vmem>>, vector<8x128xf32>
    %cst_9 = arith.constant dense<0.000000e+00> : vector<8x128xf32>
    %12 = tpu.matmul %11, %10, %cst_9 {dimension_numbers = #tpu.dot_dimension_numbers<[1], [1], [0], [0], [0, 0, 1, 0], [], []>} : vector<8x128xf32>, vector<128x128xf32>, vector<8x128xf32> -> vector<8x128xf32>
    %c0_10 = arith.constant 0 : index
    %c0_11 = arith.constant 0 : index
    %13 = vector.load %arg8[%c0_10, %c0_11] : memref<8x128xf32, #tpu.memory_space<vmem>>, vector<8x128xf32>
    tpu.vector_store %arg8[%c0_10, %c0_11], %12 {strides = array<i32>} : memref<8x128xf32, #tpu.memory_space<vmem>>, vector<8x128xf32>,
    %c0_12 = arith.constant 0 : index
    %c0_13 = arith.constant 0 : index
    %14 = vector.load %arg2[%c0_12, %c0_13] : memref<128x128xbf16, #tpu.memory_space<vmem>>, vector<128x128xbf16>
    %c0_14 = arith.constant 0 : index
    %c0_15 = arith.constant 0 : index
    %15 = vector.load %arg5[%c0_14, %c0_15] : memref<128x128xbf16, #tpu.memory_space<vmem>>, vector<128x128xbf16>
    %cst_16 = arith.constant dense<0.000000e+00> : vector<128x128xf32>
    %16 = tpu.matmul %14, %15, %cst_16 {dimension_numbers = #tpu.dot_dimension_numbers<[1], [0], [0], [1], [0, 0, 1, 1], [], []>} : vector<128x128xbf16>, vector<128x128xbf16>, vector<128x128xf32> -> vector<128x128xf32>
    %c0_17 = arith.constant 0 : index
    %c0_18 = arith.constant 0 : index
    %17 = vector.load %arg6[%c0_17, %c0_18] : memref<1x128xf32, #tpu.memory_space<vmem>>, vector<1x128xf32>
    %18 = vector.broadcast %17 : vector<1x128xf32> to vector<128x128xf32>
    %19 = arith.addf %16, %18 : vector<128x128xf32>
    %20 = arith.truncf %19 : vector<128x128xf32> to vector<128x128xbf16>
    %c0_19 = arith.constant 0 : index
    %c0_20 = arith.constant 0 : index
    %21 = vector.load %arg9[%c0_19, %c0_20] : memref<128x128xbf16, #tpu.memory_space<vmem>>, vector<128x128xbf16>
    tpu.vector_store %arg9[%c0_19, %c0_20], %20 {strides = array<i32>} : memref<128x128xbf16, #tpu.memory_space<vmem>>, vector<128x128xbf16>,
    return
  }
  func.func @transform_0(%arg0: i32) -> (i32, i32) {
    %c0_i32 = arith.constant 0 : i32
    %c0_i32_0 = arith.constant 0 : i32
    return %arg0, %c0_i32 : i32, i32
  }
  func.func @transform_1(%arg0: i32) -> (i32, i32) {
    %c0_i32 = arith.constant 0 : i32
    %c0_i32_0 = arith.constant 0 : i32
    return %arg0, %c0_i32 : i32, i32
  }
  func.func @transform_2(%arg0: i32) -> (i32, i32) {
    %c0_i32 = arith.constant 0 : i32
    %c0_i32_0 = arith.constant 0 : i32
    %c0_i32_1 = arith.constant 0 : i32
    return %c0_i32, %c0_i32_0 : i32, i32
  }
  func.func @transform_3(%arg0: i32) -> (i32, i32) {
    %c0_i32 = arith.constant 0 : i32
    %c0_i32_0 = arith.constant 0 : i32
    %c0_i32_1 = arith.constant 0 : i32
    return %c0_i32, %c0_i32_0 : i32, i32
  }
  func.func @transform_4(%arg0: i32) -> (i32, i32) {
    %c0_i32 = arith.constant 0 : i32
    %c0_i32_0 = arith.constant 0 : i32
    %c0_i32_1 = arith.constant 0 : i32
    return %c0_i32, %c0_i32_0 : i32, i32
  }
  func.func @transform_5(%arg0: i32) -> (i32, i32) {
    %c0_i32 = arith.constant 0 : i32
    %c0_i32_0 = arith.constant 0 : i32
    %c0_i32_1 = arith.constant 0 : i32
    return %c0_i32, %c0_i32_0 : i32, i32
  }
  func.func @transform_6(%arg0: i32) -> (i32, i32) {
    %c0_i32 = arith.constant 0 : i32
    %c0_i32_0 = arith.constant 0 : i32
    %c0_i32_1 = arith.constant 0 : i32
    return %c0_i32, %c0_i32_0 : i32, i32
  }
  func.func @transform_7(%arg0: i32) -> (i32, i32) {
    %c0_i32 = arith.constant 0 : i32
    %c0_i32_0 = arith.constant 0 : i32
    return %c0_i32, %arg0 : i32, i32
  }
  func.func @transform_8(%arg0: i32) -> (i32, i32) {
    %c0_i32 = arith.constant 0 : i32
    %c0_i32_0 = arith.constant 0 : i32
    return %arg0, %c0_i32 : i32, i32
  }
}

</mosaic_0001>

<bundles_post_ra>
// kernel: tpu_custom_call.1
= control target key start
LH: loop header
LB: loop body
LE: loop exit
PB: predicated region body
PF: predicated region fallthrough
CT: control target
= control target key end

     0   :  { %14 = vsyncpa [#allocation3], 0  ;;  %s1589_s0 = inlined_call_operand.hbm [shape: bf16[128,128], index: 0, kind: input, shape index: {}]   ;;  %s1590_s1 = inlined_call_operand.hbm [shape: bf16[128,128], index: 1, kind: input, shape index: {}]   ;;  %s1591_s2 = inlined_call_operand.hbm [shape: bf16[128,128], index: 2, kind: input, shape index: {}]   ;;  %s1592_s3 = inlined_call_operand.hbm [shape: f32[1,128], index: 3, kind: input, shape index: {}]   ;;  %s1593_s4 = inlined_call_operand.hbm [shape: bf16[128,128], index: 4, kind: input, shape index: {}]   ;;  %s1594_s5 = inlined_call_operand.hbm [shape: f32[1,128], index: 5, kind: input, shape index: {}]   ;;  %s1595_s6 = inlined_call_operand.hbm [shape: f32[8,128], index: 6, kind: input, shape index: {}]   ;;  %s1596_s7 = inlined_call_operand.hbm [shape: f32[8,128], index: 7, kind: output, shape index: {0}]   ;;  %s1597_s8 = inlined_call_operand.hbm [shape: bf16[128,128], index: 8, kind: output, shape index: {1}]  }
   0x1   :  { %15 = vsyncpa [#allocation6], 0 }
   0x2   :  { %16 = vsyncpa [#allocation9], 0 }
   0x3   :  { %17 = vsyncpa [#allocation12], 0 }
   0x4   :  { %18 = vsyncpa [#allocation4], 0 }
   0x5   :  { %19 = vsyncpa [#allocation16], 0  ;;  %s1359_s27 = smov [#allocation5]   ;;  %s1360_s29 = smov [#allocation8]  }
   0x6   :  { %s37_s28 = sshll.u32 %s1359_s27, 4  ;;  %s62_s30 = sshll.u32 %s1360_s29, 4  ;;  %s38_s28 = int_to_ptr.vmem [resolvable:$true] %s37_s28  ;;  %s1418_s30 = int_to_ptr.vmem [resolvable:$true] %s62_s30 }
   0x7   :  { %s1149_s11 = scalar_lea.hbm %s1590_s1, 1024 }
   0x8   :  { %p1150_p0 = scmp.ne.s32.totalorder %s1590_s1, %s1149_s11  ;;  %p1153_p1 = scmp.lt.u32.totalorder %s1149_s11, %s1590_s1 }
   0xa   :  { %p1155_p2 = pnand %p1153_p1, %p1150_p0 }
   0xc   :  { %1158 = shalt.err (!%p1155_p2)
}
   0xd   :  { %s1159_s16 = scalar_lea.vmem %s38_s28, 1024  ;;  %p1164_p4 = scmp.lt.s32.totalorder %s38_s28, %s38_s28 }
   0xe   :  { %p1160_p3 = scmp.ne.s32.totalorder %s38_s28, %s1159_s16  ;;  %p1165_p5 = scmp.lt.s32.totalorder %s1159_s16, %s1159_s16 }
  0x10   :  { %p1166_p6 = por %p1165_p5, %p1164_p4 }
  0x12   :  { %p1167_p7 = pnand %p1166_p6, %p1160_p3 }
  0x14   :  { %1170 = shalt.err (!%p1167_p7)
}
  0x15   :  { %s1361_s17 = smov 64   ;;  %s1362_s18 = smov 4  }
  0x16   :  { %43 = dma.hbm_to_vmem [thread:$0]  %s1590_s1, 1024, %s38_s28, [#allocation6], %s1361_s17, %s1361_s17, %s1362_s18  }
  0x17   :  { %s1171_s23 = scalar_lea.hbm %s1592_s3, 16 }
  0x18   :  { %p1172_p8 = scmp.ne.s32.totalorder %s1592_s3, %s1171_s23  ;;  %p1175_p9 = scmp.lt.u32.totalorder %s1171_s23, %s1592_s3 }
  0x1a   :  { %p1177_p10 = pnand %p1175_p9, %p1172_p8 }
  0x1c   :  { %1180 = shalt.err (!%p1177_p10)
}
  0x1d   :  { %s1181_s29 = scalar_lea.vmem %s1418_s30, 16  ;;  %s1185_s1 = scalar_lea.vmem %s1418_s30, 32 }
  0x1e   :  { %p1182_p11 = scmp.ne.s32.totalorder %s1418_s30, %s1181_s29  ;;  %p1186_p12 = scmp.lt.s32.totalorder %s1418_s30, %s1418_s30 }
  0x1f   :  { %p1187_p13 = scmp.lt.s32.totalorder %s1185_s1, %s1181_s29 }
  0x21   :  { %p1188_p0 = por %p1187_p13, %p1186_p12 }
  0x23   :  { %p1189_p1 = pnand %p1188_p0, %p1182_p11 }
  0x25   :  { %1192 = shalt.err (!%p1189_p1)
}
  0x26   :  { %65 = dma.hbm_to_vmem [thread:$0]  %s1592_s3, 16, %s1418_s30, [#allocation9]  }
  0x27   :  { %s1363_s10 = smov [#allocation11]   ;;  %s1364_s12 = smov [#allocation2]  }
  0x28   :  { %s84_s11 = sshll.u32 %s1363_s10, 4  ;;  %s25_s13 = sshll.u32 %s1364_s12, 4  ;;  %s85_s11 = int_to_ptr.vmem [resolvable:$true] %s84_s11  ;;  %s1453_s13 = int_to_ptr.vmem [resolvable:$true] %s25_s13 }
  0x29   :  { %s1193_s16 = scalar_lea.hbm %s1594_s5, 16 }
  0x2a   :  { %p1194_p2 = scmp.ne.s32.totalorder %s1594_s5, %s1193_s16  ;;  %p1197_p3 = scmp.lt.u32.totalorder %s1193_s16, %s1594_s5 }
  0x2c   :  { %p1199_p4 = pnand %p1197_p3, %p1194_p2 }
  0x2e   :  { %1202 = shalt.err (!%p1199_p4)
}
  0x2f   :  { %s1203_s3 = scalar_lea.vmem %s85_s11, 16  ;;  %s1207_s30 = scalar_lea.vmem %s85_s11, 32 }
  0x30   :  { %p1204_p5 = scmp.ne.s32.totalorder %s85_s11, %s1203_s3  ;;  %p1208_p6 = scmp.lt.s32.totalorder %s85_s11, %s85_s11 }
  0x31   :  { %p1209_p7 = scmp.lt.s32.totalorder %s1207_s30, %s1203_s3 }
  0x33   :  { %p1210_p8 = por %p1209_p7, %p1208_p6 }
  0x35   :  { %p1211_p9 = pnand %p1210_p8, %p1204_p5 }
  0x37   :  { %1214 = shalt.err (!%p1211_p9)
}
  0x38   :  { %87 = dma.hbm_to_vmem [thread:$0]  %s1594_s5, 16, %s85_s11, [#allocation12]  }
  0x39   :  { %s1215_s27 = scalar_lea.hbm %s1589_s0, 1024 }
  0x3a   :  { %p1216_p10 = scmp.ne.s32.totalorder %s1589_s0, %s1215_s27  ;;  %p1219_p11 = scmp.lt.u32.totalorder %s1215_s27, %s1589_s0 }
  0x3c   :  { %p1221_p12 = pnand %p1219_p11, %p1216_p10 }
  0x3e   :  { %1224 = shalt.err (!%p1221_p12)
}
  0x3f   :  { %s1225_s10 = scalar_lea.vmem %s1453_s13, 1024  ;;  %p1230_p0 = scmp.lt.s32.totalorder %s1453_s13, %s1453_s13 }
  0x40   :  { %p1226_p13 = scmp.ne.s32.totalorder %s1453_s13, %s1225_s10  ;;  %p1231_p1 = scmp.lt.s32.totalorder %s1225_s10, %s1225_s10 }
  0x42   :  { %p1232_p2 = por %p1231_p1, %p1230_p0 }
  0x44   :  { %p1233_p3 = pnand %p1232_p2, %p1226_p13 }
  0x46   :  { %1236 = shalt.err (!%p1233_p3)
}
  0x47   :  { %31 = dma.hbm_to_vmem [thread:$0]  %s1589_s0, 1024, %s1453_s13, [#allocation3], %s1361_s17, %s1361_s17, %s1362_s18  }
  0x48   :  { %s1365_s12 = smov [#allocation7]   ;;  %s1366_s15 = smov [#allocation10]  }
  0x49   :  { %s49_s14 = sshll.u32 %s1365_s12, 4  ;;  %s71_s16 = sshll.u32 %s1366_s15, 4  ;;  %s50_s14 = int_to_ptr.vmem [resolvable:$true] %s49_s14  ;;  %s1487_s16 = int_to_ptr.vmem [resolvable:$true] %s71_s16 }
  0x4a   :  { %s1237_s21 = scalar_lea.hbm %s1591_s2, 1024 }
  0x4b   :  { %p1238_p4 = scmp.ne.s32.totalorder %s1591_s2, %s1237_s21  ;;  %p1241_p5 = scmp.lt.u32.totalorder %s1237_s21, %s1591_s2 }
  0x4d   :  { %p1243_p6 = pnand %p1241_p5, %p1238_p4 }
  0x4f   :  { %1246 = shalt.err (!%p1243_p6)
}
  0x50   :  { %s1247_s0 = scalar_lea.vmem %s50_s14, 1024  ;;  %p1252_p8 = scmp.lt.s32.totalorder %s50_s14, %s50_s14 }
  0x51   :  { %p1248_p7 = scmp.ne.s32.totalorder %s50_s14, %s1247_s0  ;;  %p1253_p9 = scmp.lt.s32.totalorder %s1247_s0, %s1247_s0 }
  0x53   :  { %p1254_p10 = por %p1253_p9, %p1252_p8 }
  0x55   :  { %p1255_p11 = pnand %p1254_p10, %p1248_p7 }
  0x57   :  { %1258 = shalt.err (!%p1255_p11)
}
  0x58   :  { %55 = dma.hbm_to_vmem [thread:$0]  %s1591_s2, 1024, %s50_s14, [#allocation6], %s1361_s17, %s1361_s17, %s1362_s18  }
  0x59   :  { %s1259_s27 = scalar_lea.hbm %s1593_s4, 1024 }
  0x5a   :  { %p1260_p12 = scmp.ne.s32.totalorder %s1593_s4, %s1259_s27  ;;  %p1263_p13 = scmp.lt.u32.totalorder %s1259_s27, %s1593_s4 }
  0x5c   :  { %p1265_p0 = pnand %p1263_p13, %p1260_p12 }
  0x5e   :  { %1268 = shalt.err (!%p1265_p0)
}
  0x5f   :  { %s1269_s10 = scalar_lea.vmem %s1487_s16, 1024  ;;  %p1274_p2 = scmp.lt.s32.totalorder %s1487_s16, %s1487_s16 }
  0x60   :  { %p1270_p1 = scmp.ne.s32.totalorder %s1487_s16, %s1269_s10  ;;  %p1275_p3 = scmp.lt.s32.totalorder %s1269_s10, %s1269_s10 }
  0x62   :  { %p1276_p4 = por %p1275_p3, %p1274_p2 }
  0x64   :  { %p1277_p5 = pnand %p1276_p4, %p1270_p1 }
  0x66   :  { %1280 = shalt.err (!%p1277_p5)
}
  0x67   :  { %77 = dma.hbm_to_vmem [thread:$0]  %s1593_s4, 1024, %s1487_s16, [#allocation9], %s1361_s17, %s1361_s17, %s1362_s18  }
  0x68   :  { %s1367_s11 = smov [#allocation13]   ;;  %s1281_s19 = scalar_lea.hbm %s1595_s6, 128 }
  0x69   :  { %s94_s12 = sshll.u32 %s1367_s11, 4  ;;  %p1282_p6 = scmp.ne.s32.totalorder %s1595_s6, %s1281_s19  ;;  %s95_s12 = int_to_ptr.vmem [resolvable:$true] %s94_s12 }
  0x6a   :  { %p1285_p7 = scmp.lt.u32.totalorder %s1281_s19, %s1595_s6 }
  0x6c   :  { %p1287_p8 = pnand %p1285_p7, %p1282_p6 }
  0x6e   :  { %1290 = shalt.err (!%p1287_p8)
}
  0x6f   :  { %s1291_s30 = scalar_lea.vmem %s95_s12, 128  ;;  %p1296_p10 = scmp.lt.s32.totalorder %s95_s12, %s95_s12 }
  0x70   :  { %p1292_p9 = scmp.ne.s32.totalorder %s95_s12, %s1291_s30  ;;  %p1297_p11 = scmp.lt.s32.totalorder %s1291_s30, %s1291_s30 }
  0x72   :  { %p1298_p12 = por %p1297_p11, %p1296_p10 }
  0x74   :  { %p1299_p13 = pnand %p1298_p12, %p1292_p9 }
  0x76   :  { %1302 = shalt.err (!%p1299_p13)
}
  0x77   :  { %97 = dma.hbm_to_vmem [thread:$0]  %s1595_s6, 128, %s95_s12, [#allocation12]  }
  0x78   :  { %1347 = dma.done.wait [#allocation3], 1024  }
  0x79   :  { %1348 = vsyncadd [#allocation3], 4294966272 }
  0x7a   :  { %1349 = dma.done.wait [#allocation6], 2048  }
  0x7b   :  { %1350 = vsyncadd [#allocation6], 4294965248 }
  0x7c   :  { %1351 = dma.done.wait [#allocation9], 1040  }
  0x7d   :  { %1352 = vsyncadd [#allocation9], 4294966256 }
  0x7e   :  { %1353 = dma.done.wait [#allocation12], 144  }
  0x7f   :  { %1354 = vsyncadd [#allocation12], 4294967152  ;;  %v1117_v0 = vld [vmem:[#allocation7] sm:$0xff]   ;;  %v1118_v1 = vld [vmem:[#allocation7 + $0x8] sm:$0xff]   ;;  %v1368_v17 = vmov 0.0|0.0   ;;  %vm1369_vm0 = vmmov 0  }
  0x80   :  { %980 = vmatprep.subr.bf16.mxu0 %v1117_v0  ;;  %v1119_v2 = vld [vmem:[#allocation7 + $0x10] sm:$0xff]   ;;  %v1120_v3 = vld [vmem:[#allocation7 + $0x18] sm:$0xff]   ;;  %v1125_v4 = vld [vmem:[#allocation2] sm:$0xff]   ;;  %1079 = vmatprep.subr.bf16.mxu1 %v1368_v17  ;;  %v1370_v33 = vmov 0.0   ;;  %s1371_s6 = smov [#allocation15]  }
  0x81   :  { %981 = vmatpush3.bf16.msra.mxu0 %v1117_v0  ;;  %996 = vmatprep.mubr.bf16.mxu0 %v1125_v4  ;;  %v1121_v5 = vld [vmem:[#allocation7 + $0x20] sm:$0xff]   ;;  %v1122_v6 = vld [vmem:[#allocation7 + $0x28] sm:$0xff]   ;;  %v1123_v7 = vld [vmem:[#allocation7 + $0x30] sm:$0xff]   ;;  %s799_s23 = sshll.u32 %s1371_s6, 4  ;;  %s800_s23 = int_to_ptr.vmem [resolvable:$true] %s799_s23 }
  0x82   :  { %982 = vmatprep.subr.bf16.mxu0 %v1118_v1  ;;  %v1124_v8 = vld [vmem:[#allocation7 + $0x38] sm:$0xff]   ;;  %v1126_v9 = vld [vmem:[#allocation2 + $0x8] sm:$0xff]   ;;  %v1127_v10 = vld [vmem:[#allocation2 + $0x10] sm:$0xff]   ;;  %1044 = vmatprep.mubr.msk.f32.mxu1 %vm1369_vm0, %v1370_v33  ;;  %s1303_s0 = scalar_lea.vmem %s800_s23, 1024  ;;  %p1308_p1 = scmp.lt.s32.totalorder %s800_s23, %s800_s23 }
  0x83   :  { %v1128_v11 = vld [vmem:[#allocation2 + $0x18] sm:$0xff]   ;;  %v1129_v12 = vld [vmem:[#allocation2 + $0x20] sm:$0xff]   ;;  %v1130_v13 = vld [vmem:[#allocation2 + $0x28] sm:$0xff]   ;;  %p1304_p0 = scmp.ne.s32.totalorder %s800_s23, %s1303_s0  ;;  %p1309_p2 = scmp.lt.s32.totalorder %s1303_s0, %s1303_s0 }
  0x84   :  { %v1131_v14 = vld [vmem:[#allocation2 + $0x30] sm:$0xff]   ;;  %v1132_v15 = vld [vmem:[#allocation2 + $0x38] sm:$0xff]   ;;  %v1133_v16 = vld [vmem:[#allocation10] sm:$0xff]  }
  0x85   :  { %983 = vmatpush3.bf16.msra.mxu0 %v1118_v1  ;;  %v1134_v18 = vld [vmem:[#allocation10 + $0x8] sm:$0xff]   ;;  %v1135_v19 = vld [vmem:[#allocation10 + $0x10] sm:$0xff]   ;;  %v1136_v20 = vld [vmem:[#allocation10 + $0x18] sm:$0xff]   ;;  %p1310_p3 = por %p1309_p2, %p1308_p1 }
  0x86   :  { %984 = vmatprep.subr.bf16.mxu0 %v1119_v2  ;;  %v1137_v21 = vld [vmem:[#allocation10 + $0x20] sm:$0xff]   ;;  %v1138_v22 = vld [vmem:[#allocation10 + $0x28] sm:$0xff]   ;;  %v1139_v23 = vld [vmem:[#allocation10 + $0x30] sm:$0xff]  }
  0x87   :  { %v1140_v24 = vld [vmem:[#allocation10 + $0x38] sm:$0xff]   ;;  %v1142_v26 = vld [vmem:[#allocation5 + $0x8] sm:$0xff]   ;;  %v1143_v27 = vld [vmem:[#allocation5 + $0x10] sm:$0xff]   ;;  %p1311_p4 = pnand %p1310_p3, %p1304_p0 }
  0x88   :  { %v1141_v25 = vld [vmem:[#allocation5] sm:$0xff]   ;;  %v1144_v28 = vld [vmem:[#allocation5 + $0x18] sm:$0xff]   ;;  %v1146_v30 = vld [vmem:[#allocation5 + $0x28] sm:$0xff]  }
  0x89   :  { %985 = vmatpush3.bf16.msra.mxu0 %v1119_v2  ;;  %v1145_v29 = vld [vmem:[#allocation5 + $0x20] sm:$0xff]   ;;  %v1147_v31 = vld [vmem:[#allocation5 + $0x30] sm:$0xff]   ;;  %v1148_v32 = vld [vmem:[#allocation5 + $0x38] sm:$0xff]  }
  0x8a   :  { %986 = vmatprep.subr.bf16.mxu0 %v1120_v3  ;;  %v1537_v34 = vld [vmem:[#allocation8] ss:$0 sm:$0xff] }
  0x8d   :  { %987 = vmatpush3.bf16.msra.mxu0 %v1120_v3 }
  0x8e   :  { %988 = vmatprep.subr.bf16.mxu0 %v1121_v5 }
  0x91   :  { %989 = vmatpush3.bf16.msra.mxu0 %v1121_v5 }
  0x92   :  { %990 = vmatprep.subr.bf16.mxu0 %v1122_v6 }
  0x95   :  { %991 = vmatpush3.bf16.msra.mxu0 %v1122_v6 }
  0x96   :  { %992 = vmatprep.subr.bf16.mxu0 %v1123_v7 }
  0x99   :  { %993 = vmatpush3.bf16.msra.mxu0 %v1123_v7 }
  0x9a   :  { %994 = vmatprep.subr.bf16.mxu0 %v1124_v8 }
  0x9d   :  { %995 = vmatpush3.bf16.msra.mxu0 %v1124_v8 }
  0x9e   :  { %1047 = vmatprep.subr.bf16.mxu0 %v1133_v16 }
  0xa0   :  { %997 = vmatmul.mubr.bf16.vlgmr.msra.gmra.mrb[0].mxu0 %v1126_v9 }
  0xa1   :  { %1000 = vmatprep.mubr.bf16.mxu0 %v1127_v10  ;;  %1048 = vmatpush3.bf16.msra.mxu0 %v1133_v16 }
  0xa2   :  { %1049 = vmatprep.subr.bf16.mxu0 %v1134_v18 }
  0xa5   :  { %1050 = vmatpush3.bf16.msra.mxu0 %v1134_v18 }
  0xa6   :  { %1051 = vmatprep.subr.bf16.mxu0 %v1135_v19 }
  0xa8   :  { %1001 = vmatmul.mubr.bf16.gmra.mrb[4].mxu0 %v1128_v11 }
  0xa9   :  { %1004 = vmatprep.mubr.bf16.mxu0 %v1129_v12  ;;  %1052 = vmatpush3.bf16.msra.mxu0 %v1135_v19 }
  0xaa   :  { %1053 = vmatprep.subr.bf16.mxu0 %v1136_v20 }
  0xad   :  { %1054 = vmatpush3.bf16.msra.mxu0 %v1136_v20 }
  0xae   :  { %1055 = vmatprep.subr.bf16.mxu0 %v1137_v21 }
  0xb0   :  { %1005 = vmatmul.mubr.bf16.gmra.mrb[8].mxu0 %v1130_v13 }
  0xb1   :  { %1008 = vmatprep.mubr.bf16.mxu0 %v1131_v14  ;;  %1056 = vmatpush3.bf16.msra.mxu0 %v1137_v21 }
  0xb2   :  { %1057 = vmatprep.subr.bf16.mxu0 %v1138_v22 }
  0xb5   :  { %1058 = vmatpush3.bf16.msra.mxu0 %v1138_v22 }
  0xb6   :  { %1059 = vmatprep.subr.bf16.mxu0 %v1139_v23 }
  0xb8   :  { %1009 = vmatmul.mubr.bf16.gmra.mrb[12].mxu0 %v1132_v15 }
  0xb9   :  { %1060 = vmatpush3.bf16.msra.mxu0 %v1139_v23  ;;  %1063 = vmatprep.mubr.bf16.mxu0 %v1141_v25 }
  0xba   :  { %1061 = vmatprep.subr.bf16.mxu0 %v1140_v24 }
  0xbd   :  { %1062 = vmatpush3.bf16.msra.mxu0 %v1140_v24 }
  0xc0   :  { %1064 = vmatmul.mubr.bf16.vlgmr.msra.gmra.mrb[16].mxu0 %v1142_v26 }
  0xc1   :  { %1067 = vmatprep.mubr.bf16.mxu0 %v1143_v27 }
  0xc8   :  { %1068 = vmatmul.mubr.bf16.gmra.mrb[20].mxu0 %v1144_v28 }
  0xc9   :  { %1071 = vmatprep.mubr.bf16.mxu0 %v1145_v29 }
  0xd0   :  { %1072 = vmatmul.mubr.bf16.gmra.mrb[24].mxu0 %v1146_v30 }
  0xd1   :  { %1075 = vmatprep.mubr.bf16.mxu0 %v1147_v31 }
  0xd8   :  { %1076 = vmatmul.mubr.bf16.gmra.mrb[28].mxu0 %v1148_v32 }
 0x173   :  { %v998_v35 = vpop.f32.mrb[0].mxu0 }
 0x174   :  { %v298_v36 = vadd.f32 %v998_v35, %v1537_v34  ;;  %v289_v37 = vpop.f32.mrb[1].mxu0 }
 0x175   :  { %v290_v38 = vadd.f32 %v1537_v34, %v289_v37  ;;  %v999_v39 = vpop.f32.mrb[2].mxu0 }
 0x176   :  { %v370_v40 = vmul.f32 0.2, %v298_v36  ;;  %v301_v41 = vadd.f32 %v999_v39, %v1537_v34  ;;  %v292_v42 = vpop.f32.mrb[3].mxu0  ;;  %vm354_vm1 = vcmp.ge.f32.partialorder %v298_v36, 0.0 }
 0x177   :  { %v368_v43 = vmul.f32 0.2, %v290_v38  ;;  %v293_v44 = vadd.f32 %v1537_v34, %v292_v42  ;;  %vm352_vm3 = vcmp.ge.f32.partialorder %v290_v38, 0.0 }
 0x178   :  { %vm355_vm2 = vcmp.ge.f32.partialorder %v301_v41, 0.0  ;;  %v371_v45 = vmul.f32 0.2, %v301_v41  ;;  %v386_v47 = vsel %vm354_vm1, %v298_v36, %v370_v40 }
 0x179   :  { %v369_v46 = vmul.f32 0.2, %v293_v44  ;;  %vm353_vm4 = vcmp.ge.f32.partialorder %v293_v44, 0.0  ;;  %v384_v50 = vsel %vm352_vm3, %v290_v38, %v368_v43 }
 0x17a   :  { %v387_v48 = vsel %vm355_vm2, %v301_v41, %v371_v45  ;;  %v835_v45 = vld [vmem:[#allocation11] ss:$0 sm:$0xff] }
 0x17b   :  { %v1002_v49 = vpop.f32.mrb[4].mxu0  ;;  %v385_v51 = vsel %vm353_vm4, %v293_v44, %v369_v46  ;;  %v1083_v52 = vpack.c.bf16 %v387_v48, %v386_v47 }
 0x17c   :  { %v314_v53 = vadd.f32 %v1002_v49, %v1537_v34  ;;  %v1080_v54 = vpack.c.bf16 %v385_v51, %v384_v50  ;;  %v305_v55 = vpop.f32.mrb[5].mxu0 }
 0x17d   :  { %v306_v56 = vadd.f32 %v1537_v34, %v305_v55  ;;  %v1003_v57 = vpop.f32.mrb[6].mxu0 }
 0x17e   :  { %vm358_vm5 = vcmp.ge.f32.partialorder %v314_v53, 0.0  ;;  %v374_v58 = vmul.f32 0.2, %v314_v53  ;;  %1081 = vmatpush3.bf16.xpose.msra.mxu1 %v1080_v54  ;;  %v317_v59 = vadd.f32 %v1003_v57, %v1537_v34  ;;  %v308_v60 = vpop.f32.mrb[7].mxu0 }
 0x17f   :  { %vm356_vm6 = vcmp.ge.f32.partialorder %v306_v56, 0.0  ;;  %v372_v61 = vmul.f32 0.2, %v306_v56  ;;  %v309_v62 = vadd.f32 %v1537_v34, %v308_v60  ;;  %1082 = vmatprep.subr.bf16.mxu1 %v1368_v17 }
 0x180   :  { %vm359_vm7 = vcmp.ge.f32.partialorder %v317_v59, 0.0  ;;  %v375_v63 = vmul.f32 0.2, %v317_v59  ;;  %v390_v0 = vsel %vm358_vm5, %v314_v53, %v374_v58 }
 0x181   :  { %vm357_vm8 = vcmp.ge.f32.partialorder %v309_v62, 0.0  ;;  %v373_v1 = vmul.f32 0.2, %v309_v62  ;;  %v388_v2 = vsel %vm356_vm6, %v306_v56, %v372_v61 }
 0x182   :  { %v391_v3 = vsel %vm359_vm7, %v317_v59, %v375_v63 }
 0x183   :  { %v1006_v4 = vpop.f32.mrb[8].mxu0  ;;  %v389_v5 = vsel %vm357_vm8, %v309_v62, %v373_v1  ;;  %v1089_v6 = vpack.c.bf16 %v391_v3, %v390_v0 }
 0x184   :  { %v330_v7 = vadd.f32 %v1006_v4, %v1537_v34  ;;  %v1086_v8 = vpack.c.bf16 %v389_v5, %v388_v2  ;;  %v321_v9 = vpop.f32.mrb[9].mxu0 }
 0x185   :  { %v322_v10 = vadd.f32 %v1537_v34, %v321_v9  ;;  %v1007_v11 = vpop.f32.mrb[10].mxu0 }
 0x186   :  { %1084 = vmatpush3.bf16.xpose.msra.mxu1 %v1083_v52  ;;  %vm362_vm9 = vcmp.ge.f32.partialorder %v330_v7, 0.0  ;;  %v378_v12 = vmul.f32 0.2, %v330_v7  ;;  %v333_v13 = vadd.f32 %v1007_v11, %v1537_v34  ;;  %v324_v14 = vpop.f32.mrb[11].mxu0 }
 0x187   :  { %1085 = vmatprep.subr.bf16.mxu1 %v1368_v17  ;;  %vm360_vm10 = vcmp.ge.f32.partialorder %v322_v10, 0.0  ;;  %v376_v15 = vmul.f32 0.2, %v322_v10  ;;  %v325_v16 = vadd.f32 %v1537_v34, %v324_v14 }
 0x188   :  { %vm363_vm11 = vcmp.ge.f32.partialorder %v333_v13, 0.0  ;;  %v379_v18 = vmul.f32 0.2, %v333_v13  ;;  %v394_v19 = vsel %vm362_vm9, %v330_v7, %v378_v12 }
 0x189   :  { %vm361_vm12 = vcmp.ge.f32.partialorder %v325_v16, 0.0  ;;  %v377_v20 = vmul.f32 0.2, %v325_v16  ;;  %v392_v21 = vsel %vm360_vm10, %v322_v10, %v376_v15 }
 0x18a   :  { %v395_v22 = vsel %vm363_vm11, %v333_v13, %v379_v18 }
 0x18b   :  { %v1010_v23 = vpop.f32.mrb[12].mxu0  ;;  %v393_v24 = vsel %vm361_vm12, %v325_v16, %v377_v20  ;;  %v1095_v25 = vpack.c.bf16 %v395_v22, %v394_v19 }
 0x18c   :  { %v346_v26 = vadd.f32 %v1010_v23, %v1537_v34  ;;  %v1092_v27 = vpack.c.bf16 %v393_v24, %v392_v21  ;;  %v337_v28 = vpop.f32.mrb[13].mxu0 }
 0x18d   :  { %v338_v29 = vadd.f32 %v1537_v34, %v337_v28  ;;  %v1011_v30 = vpop.f32.mrb[14].mxu0 }
 0x18e   :  { %1087 = vmatpush3.bf16.xpose.msra.mxu1 %v1086_v8  ;;  %vm366_vm13 = vcmp.ge.f32.partialorder %v346_v26, 0.0  ;;  %v382_v31 = vmul.f32 0.2, %v346_v26  ;;  %v349_v32 = vadd.f32 %v1011_v30, %v1537_v34  ;;  %v340_v33 = vpop.f32.mrb[15].mxu0 }
 0x18f   :  { %1088 = vmatprep.subr.bf16.mxu1 %v1368_v17  ;;  %vm364_vm14 = vcmp.ge.f32.partialorder %v338_v29, 0.0  ;;  %v380_v35 = vmul.f32 0.2, %v338_v29  ;;  %v341_v36 = vadd.f32 %v1537_v34, %v340_v33  ;;  %v400_v34 = vld [vmem:[#allocation13] sm:$0xff] }
 0x190   :  { %vm367_vm15 = vcmp.ge.f32.partialorder %v349_v32, 0.0  ;;  %v383_v37 = vmul.f32 0.2, %v349_v32  ;;  %v398_v38 = vsel %vm366_vm13, %v346_v26, %v382_v31 }
 0x191   :  { %vm365_vm0 = vcmp.ge.f32.partialorder %v341_v36, 0.0  ;;  %v381_v39 = vmul.f32 0.2, %v341_v36  ;;  %v396_v40 = vsel %vm364_vm14, %v338_v29, %v380_v35 }
 0x192   :  { %v399_v41 = vsel %vm367_vm15, %v349_v32, %v383_v37 }
 0x193   :  { %v397_v42 = vsel %vm365_vm0, %v341_v36, %v381_v39  ;;  %v1101_v43 = vpack.c.bf16 %v399_v41, %v398_v38  ;;  %v1065_v46 = vpop.f32.mrb[16].mxu0 }
 0x194   :  { %v1098_v44 = vpack.c.bf16 %v397_v42, %v396_v40  ;;  %v650_v47 = vadd.f32 %v1065_v46, %v835_v45  ;;  %v641_v48 = vpop.f32.mrb[17].mxu0 }
 0x195   :  { %v642_v49 = vadd.f32 %v835_v45, %v641_v48  ;;  %v1066_v50 = vpop.f32.mrb[18].mxu0 }
 0x196   :  { %1090 = vmatpush3.bf16.xpose.msra.mxu1 %v1089_v6  ;;  %v653_v51 = vadd.f32 %v1066_v50, %v835_v45  ;;  %v644_v52 = vpop.f32.mrb[19].mxu0 }
 0x197   :  { %1091 = vmatprep.subr.bf16.mxu1 %v1368_v17  ;;  %v645_v53 = vadd.f32 %v835_v45, %v644_v52 }
 0x198   :  { %v892_v54 = vpack.c.bf16 %v653_v51, %v650_v47 }
 0x199   :  { %v887_v55 = vpack.c.bf16 %v645_v53, %v642_v49 }
 0x19a   :  { %924 = vst [vmem:[#allocation15 + $0x8] sm:$0xff] %v892_v54  }
 0x19b   :  { %888 = vst [vmem:[#allocation15] sm:$0xff] %v887_v55   ;;  %v1069_v56 = vpop.f32.mrb[20].mxu0 }
 0x19c   :  { %v666_v57 = vadd.f32 %v1069_v56, %v835_v45  ;;  %v657_v58 = vpop.f32.mrb[21].mxu0 }
 0x19d   :  { %v1070_v59 = vpop.f32.mrb[22].mxu0 }
 0x19e   :  { %1093 = vmatpush3.bf16.xpose.msra.mxu1 %v1092_v27  ;;  %v669_v60 = vadd.f32 %v1070_v59, %v835_v45  ;;  %v660_v61 = vpop.f32.mrb[23].mxu0 }
 0x19f   :  { %1094 = vmatprep.subr.bf16.mxu1 %v1368_v17  ;;  %v661_v62 = vadd.f32 %v835_v45, %v660_v61 }
 0x1a0   :  { %v902_v63 = vpack.c.bf16 %v669_v60, %v666_v57 }
 0x1a2   :  { %926 = vst [vmem:[#allocation15 + $0x18] sm:$0xff] %v902_v63  }
 0x1a3   :  { %v1073_v1 = vpop.f32.mrb[24].mxu0 }
 0x1a4   :  { %v682_v2 = vadd.f32 %v1073_v1, %v835_v45  ;;  %v673_v3 = vpop.f32.mrb[25].mxu0 }
 0x1a5   :  { %v674_v4 = vadd.f32 %v835_v45, %v673_v3  ;;  %v1074_v5 = vpop.f32.mrb[26].mxu0 }
 0x1a6   :  { %1096 = vmatpush3.bf16.xpose.msra.mxu1 %v1095_v25  ;;  %v685_v6 = vadd.f32 %v1074_v5, %v835_v45  ;;  %v676_v7 = vpop.f32.mrb[27].mxu0 }
 0x1a7   :  { %1097 = vmatprep.subr.bf16.mxu1 %v1368_v17  ;;  %v677_v8 = vadd.f32 %v835_v45, %v676_v7 }
 0x1a8   :  { %v912_v9 = vpack.c.bf16 %v685_v6, %v682_v2 }
 0x1a9   :  { %v907_v10 = vpack.c.bf16 %v677_v8, %v674_v4 }
 0x1aa   :  { %928 = vst [vmem:[#allocation15 + $0x28] sm:$0xff] %v912_v9  }
 0x1ab   :  { %927 = vst [vmem:[#allocation15 + $0x20] sm:$0xff] %v907_v10   ;;  %v1077_v11 = vpop.f32.mrb[28].mxu0 }
 0x1ac   :  { %v698_v12 = vadd.f32 %v1077_v11, %v835_v45  ;;  %v689_v13 = vpop.f32.mrb[29].mxu0 }
 0x1ad   :  { %v690_v14 = vadd.f32 %v835_v45, %v689_v13  ;;  %v1078_v15 = vpop.f32.mrb[30].mxu0 }
 0x1ae   :  { %1099 = vmatpush3.bf16.xpose.msra.mxu1 %v1098_v44  ;;  %v701_v16 = vadd.f32 %v1078_v15, %v835_v45  ;;  %v692_v18 = vpop.f32.mrb[31].mxu0 }
 0x1af   :  { %1100 = vmatprep.subr.bf16.mxu1 %v1368_v17  ;;  %v658_v17 = vadd.f32 %v835_v45, %v657_v58  ;;  %v693_v19 = vadd.f32 %v835_v45, %v692_v18 }
 0x1b0   :  { %v922_v20 = vpack.c.bf16 %v701_v16, %v698_v12 }
 0x1b1   :  { %v897_v0 = vpack.c.bf16 %v661_v62, %v658_v17  ;;  %v917_v21 = vpack.c.bf16 %v693_v19, %v690_v14 }
 0x1b2   :  { %930 = vst [vmem:[#allocation15 + $0x38] sm:$0xff] %v922_v20  }
 0x1b3   :  { %925 = vst [vmem:[#allocation15 + $0x10] sm:$0xff] %v897_v0   ;;  %929 = vst [vmem:[#allocation15 + $0x30] sm:$0xff] %v917_v21  }
 0x1b6   :  { %1102 = vmatpush3.bf16.xpose.msra.mxu1 %v1101_v43 }
 0x1bd   :  { %1045 = vmatmul.mubr.f32.vlgmr.msra.gmra.mrb[0].mxu1 %v400_v34 }
 0x1be   :  { %1314 = shalt.err (!%p1311_p4)
}
 0x1bf   :  { %s1315_s25 = scalar_lea.hbm %s1597_s8, 1024 }
 0x1c0   :  { %p1316_p5 = scmp.ne.s32.totalorder %s1597_s8, %s1315_s25  ;;  %p1319_p6 = scmp.lt.u32.totalorder %s1315_s25, %s1597_s8 }
 0x1c2   :  { %p1321_p7 = pnand %p1319_p6, %p1316_p5 }
 0x1c4   :  { %1324 = shalt.err (!%p1321_p7)
}
 0x1c5   :  { %805 = dma.vmem_to_hbm [thread:$0]  %s800_s23, 1024, %s1597_s8, [#allocation16], %s1361_s17, %s1361_s17, %s1362_s18  }
 0x1c6   :  { %s1372_s10 = smov [#allocation14]  }
 0x1c7   :  { %s790_s2 = sshll.u32 %s1372_s10, 4  ;;  %s791_s2 = int_to_ptr.vmem [resolvable:$true] %s790_s2 }
 0x1c8   :  { %s1325_s5 = scalar_lea.vmem %s791_s2, 128  ;;  %p1330_p9 = scmp.lt.s32.totalorder %s791_s2, %s791_s2 }
 0x1c9   :  { %p1326_p8 = scmp.ne.s32.totalorder %s791_s2, %s1325_s5  ;;  %p1331_p10 = scmp.lt.s32.totalorder %s1325_s5, %s1325_s5 }
 0x1cb   :  { %p1332_p11 = por %p1331_p10, %p1330_p9 }
 0x1cd   :  { %p1333_p12 = pnand %p1332_p11, %p1326_p8 }
 0x290   :  { %v467_v22 = vpop.f32.mrb[0].mxu1 }
 0x291   :  { %471 = vst [vmem:[#allocation14] sm:$0xff] %v467_v22  ;;  %v1046_v23 = vpop.f32.mrb[1].mxu1 }
 0x292   :  { %1336 = shalt.err (!%p1333_p12)
}
 0x293   :  { %s1337_s14 = scalar_lea.hbm %s1596_s7, 128 }
 0x294   :  { %p1338_p13 = scmp.ne.s32.totalorder %s1596_s7, %s1337_s14  ;;  %p1341_p0 = scmp.lt.u32.totalorder %s1337_s14, %s1596_s7 }
 0x296   :  { %p1343_p1 = pnand %p1341_p0, %p1338_p13 }
 0x298   :  { %1346 = shalt.err (!%p1343_p1)
}
 0x299   :  { %793 = dma.vmem_to_hbm [thread:$0]  %s791_s2, 128, %s1596_s7, [#allocation4]  }
 0x29a   :  { %1355 = dma.done.wait [#allocation4], 128  }
 0x29b   :  { %1356 = vsyncadd [#allocation4], 4294967168 }
 0x29c   :  { %1357 = dma.done.wait [#allocation16], 1024  }
 0x29d   :  { %1358 = vsyncadd [#allocation16], 4294966272 }
 0x29e   :  { %812 = vsyncpa [#allocation3], 1 }
 0x29f   :  { %813 = vsyncpa [#allocation6], 1 }
 0x2a0   :  { %814 = vsyncpa [#allocation9], 1 }
 0x2a1   :  { %815 = vsyncpa [#allocation12], 1 }
 0x2a2   :  { %816 = vsyncpa [#allocation4], 1 }
 0x2a3   :  { %817 = vsyncpa [#allocation16], 1 }

</bundles_post_ra>
